<compile_context>
chip_gen: v6e
topology: v6e:2x2x1
jax: 0.10.0
libtpu: 0.0.40
codegen_flags: <defaults>
</compile_context>

<pallas_src>
import functools

import jax
import jax.numpy as jnp
from jax import lax
from jax.experimental import pallas as pl
from jax.experimental.pallas import tpu as pltpu


# ----------------------- pltpu.roll direction probe -------------------------

_ROLL_SIGN = None


def _roll_sign():
    """Empirically pin down pltpu.roll's shift convention with one tiny kernel.

    Returns -1 if pltpu.roll matches jnp.roll (result[i] = x[i - shift]),
    +1 for the opposite convention.  The conv taps need shifted[p] = feat[p+d];
    multiplying d by this sign makes them correct under either convention.
    Must be called OUTSIDE jit tracing.
    """
    global _ROLL_SIGN
    if _ROLL_SIGN is None:
        def probe(x_ref, o_ref):
            o_ref[...] = pltpu.roll(x_ref[...], 1, 0)

        x = jnp.arange(8 * 128, dtype=jnp.float32).reshape(8, 128)
        out = pl.pallas_call(
            probe,
            out_shape=jax.ShapeDtypeStruct((8, 128), jnp.float32),
            in_specs=[pl.BlockSpec(memory_space=pltpu.MemorySpace.VMEM)],
            out_specs=pl.BlockSpec(memory_space=pltpu.MemorySpace.VMEM),
        )(x)
        _ROLL_SIGN = -1 if float(out[1, 5]) == float(x[0, 5]) else 1
    return _ROLL_SIGN


# ------------------------------ fused kernel --------------------------------


def _fused_stages_kernel(x_ref, wc_ref, bc_ref, wl_ref, bl_ref, o_ref,
                         *, H, W, roll_sign):
    """All encoder stages + heads for one batch tile, fully resident in VMEM.

    x_ref : (tile_n, HWp8, Cp)    f32   zero-ring padded input, spatial flat
    wc_ref: (S, 9*Cp, Cp)         bf16  conv weights, tap-major deep-K rows
    bc_ref: (S, 1, Cp)            f32   conv bias (zero padded)
    wl_ref: (S, Cp, Cp)           bf16  head linear weights (zero padded)
    bl_ref: (S, 1, Cp)            f32   head linear bias (zero padded)
    o_ref : (tile_n, S, Cp)       f32   per-stage logits (first K lanes valid)
    """
    tile_n, hwp8, cp = x_ref.shape
    n_stages = wc_ref.shape[0]
    wp = W + 2
    inv_hw = 1.0 / float(H * W)

    # Interior (non-ring, non-pad) mask, built once at (1, HWp8, 1) and
    # lane/batch-broadcast where used — no full-tile int passes.
    p = lax.broadcasted_iota(jnp.int32, (1, hwp8, 1), 1)
    r, c = p // wp, p % wp
    interior = jnp.logical_and(jnp.logical_and(r >= 1, r <= H),
                               jnp.logical_and(c >= 1, c <= W))
    ring = interior.astype(jnp.float32)          # 1.0 interior, 0.0 ring/pad

    # Tap shifts on the flattened padded-spatial axis; same ordering as the
    # tap-major rows of wc (tap index = (dh+1)*3 + (dw+1)).
    shifts = [dh * wp + dw for dh in (-1, 0, 1) for dw in (-1, 0, 1)]

    feat = x_ref[...]                            # f32, zero ring already
    stage_logits = []
    for s in range(n_stages):
        # ---- enc[s]: 3x3 SAME conv as ONE deep-K (9*Cp) MXU contraction ----
        fb = feat.astype(jnp.bfloat16)           # single cast per stage
        taps = [fb if d == 0
                else pltpu.roll(fb, (roll_sign * d) % hwp8, axis=1)
                for d in shifts]                 # XLU sublane rolls (bf16)
        slab = jnp.concatenate(taps, axis=-1)    # (tile_n, hwp8, 9*Cp) bf16
        acc = lax.dot_general(
            slab, wc_ref[s],
            dimension_numbers=(((2,), (0,)), ((), ())),
            preferred_element_type=jnp.float32)  # (tile_n, hwp8, Cp) f32
        # bias + ReLU in f32, then re-zero the ring/pad rows (SAME padding for
        # the next stage and exact global-average-pool sums).
        feat = jnp.maximum(acc + bc_ref[s][None], 0.0) * ring

        # ---- head[s], fused epilogue: global average pool + Linear ---------
        pooled = jnp.sum(feat, axis=1) * inv_hw                # (tile_n, Cp)
        logits = jnp.dot(pooled.astype(jnp.bfloat16), wl_ref[s],
                         preferred_element_type=jnp.float32) + bl_ref[s]
        stage_logits.append(logits)

    # One lane-dense store of every stage's logits (no partial slice stores).
    o_ref[...] = jnp.stack(stage_logits, axis=1).astype(o_ref.dtype)


# ------------------------------ host wrappers --------------------------------


def _pack_params(params, cp):
    """Stack + zero-pad stage weights into lane-dense, deep-K-ready slabs."""
    n_stages = len(params["enc"])
    wc = jnp.zeros((n_stages, 9, cp, cp), jnp.float32)
    bc = jnp.zeros((n_stages, 1, cp), jnp.float32)
    wl = jnp.zeros((n_stages, cp, cp), jnp.float32)
    bl = jnp.zeros((n_stages, 1, cp), jnp.float32)
    for s, ((w_conv, b_conv), (w_lin, b_lin)) in enumerate(
            zip(params["enc"], params["head"])):
        _, _, cin, cout = w_conv.shape
        k = w_lin.shape[1]
        wc = wc.at[s, :, :cin, :cout].set(w_conv.reshape(9, cin, cout))
        bc = bc.at[s, 0, :cout].set(b_conv)
        wl = wl.at[s, :cout, :k].set(w_lin)
        bl = bl.at[s, 0, :k].set(b_lin)
    # tap-major deep-K rows: row index = tap*cp + cin
    wc = wc.reshape(n_stages, 9 * cp, cp)
    # bf16 MXU inputs; biases stay f32 (epilogue is f32).
    return wc.astype(jnp.bfloat16), bc, wl.astype(jnp.bfloat16), bl


def _choose_tile_n(n, hwp8, cp, n_stages):
    """Batch-tile size sized against a conservative per-generation VMEM budget."""
    # Per-row working set (bytes): 2x-buffered f32 input, bf16 feat,
    # bf16 9-tap slab, f32 conv accumulator.
    per_row = hwp8 * cp * (2 * 4 + 2 + 9 * 2 + 4)
    # Packed weights (Pallas double-buffers them; small at these sizes).
    w_bytes = 2 * n_stages * cp * ((9 * cp + cp) * 2 + 2 * 4)
    budget = 20 * 1024 * 1024          # headroom under the 32 MiB scoped limit
    t = int(max(1, min(8, (budget - w_bytes) // per_row)))
    # Keep >= 2 grid steps whenever N >= 2 so both v7x TensorCores get work.
    while t > 1 and -(-n // t) < 2:
        t -= 1
    return t


@functools.partial(jax.jit, static_argnums=(2,))
def _forward_impl(x_nchw, params, roll_sign):
    N, C, H, W = x_nchw.shape
    n_stages = len(params["enc"])
    num_classes = params["head"][0][0].shape[1]
    max_c = max([C, num_classes] + [w.shape[-1] for (w, _) in params["enc"]])
    cp = 128 * ((max_c + 127) // 128)          # lane-dense channel padding
    hp, wp = H + 2, W + 2
    hwp = hp * wp
    hwp8 = 8 * ((hwp + 7) // 8)                # sublane-align flat spatial

    # Layout plumbing (wrapper side, once):
    # NCHW -> zero-ring NHWC -> (N, hwp8, cp) lane-dense slab.
    x = jnp.transpose(x_nchw, (0, 2, 3, 1))
    x = jnp.pad(x, ((0, 0), (1, 1), (1, 1), (0, 0)))      # one-pixel zero ring
    x = x.reshape(N, hwp, C)
    x = jnp.pad(x, ((0, 0), (0, hwp8 - hwp), (0, cp - C)))

    wc, bc, wl, bl = _pack_params(params, cp)

    tile_n = _choose_tile_n(N, hwp8, cp, n_stages)
    grid_len = -(-N // tile_n)
    n_pad = grid_len * tile_n
    if n_pad != N:                              # handle N % tile_n != 0
        x = jnp.pad(x, ((0, n_pad - N), (0, 0), (0, 0)))

    out = pl.pallas_call(
        functools.partial(_fused_stages_kernel, H=H, W=W, roll_sign=roll_sign),
        out_shape=jax.ShapeDtypeStruct((n_pad, n_stages, cp), jnp.float32),
        grid_spec=pltpu.PrefetchScalarGridSpec(
            num_scalar_prefetch=0,
            grid=(grid_len,),
            in_specs=[
                pl.BlockSpec((tile_n, hwp8, cp), lambda b: (b, 0, 0)),
                pl.BlockSpec((n_stages, 9 * cp, cp), lambda b: (0, 0, 0)),
                pl.BlockSpec((n_stages, 1, cp), lambda b: (0, 0, 0)),
                pl.BlockSpec((n_stages, cp, cp), lambda b: (0, 0, 0)),
                pl.BlockSpec((n_stages, 1, cp), lambda b: (0, 0, 0)),
            ],
            out_specs=pl.BlockSpec((tile_n, n_stages, cp), lambda b: (b, 0, 0)),
        ),
        compiler_params=pltpu.CompilerParams(
            dimension_semantics=("parallel",),     # batch shards across TCs
            vmem_limit_bytes=32 * 1024 * 1024),
    )(x, wc, bc, wl, bl)

    return tuple(out[:N, s, :num_classes] for s in range(n_stages))


def multi_sub_model_forward(x_nchw, params):
    """MultiSubModel.forward(x, verbose=False) -> tuple of (N, num_classes)."""
    return _forward_impl(x_nchw, params, _roll_sign())


# --------------------------- parameter construction --------------------------


def _kaiming_normal_fan_out(key, shape_hwio):
    """kaiming_normal_(mode='fan_out', nonlinearity='relu') on HWIO weights."""
    kh, kw, cin, cout = shape_hwio
    fan_out = cout * kh * kw
    std = jnp.sqrt(2.0) / jnp.sqrt(float(fan_out))
    return jax.random.normal(key, shape_hwio, jnp.float32) * std


def _torch_linear_init(key, cin, cout):
    """PyTorch nn.Linear default: U(-1/sqrt(fan_in), 1/sqrt(fan_in))."""
    kw_, kb_ = jax.random.split(key)
    bound = 1.0 / jnp.sqrt(float(cin))
    w = jax.random.uniform(kw_, (cin, cout), jnp.float32, -bound, bound)
    b = jax.random.uniform(kb_, (cout,), jnp.float32, -bound, bound)
    return w, b


def init_multi_sub_model_params(key, in_channels, stage_channels, num_classes):
    """enc[i] = conv3x3(C_{i-1}->C_i) + ReLU ; head[i] = GAP + Linear(C_i->K)."""
    params = {"enc": [], "head": []}
    cin = in_channels
    for cout in stage_channels:
        key, kc, kh = jax.random.split(key, 3)
        w_conv = _kaiming_normal_fan_out(kc, (3, 3, cin, cout))
        b_conv = jnp.zeros((cout,), jnp.float32)
        params["enc"].append((w_conv, b_conv))
        w_lin, b_lin = _torch_linear_init(kh, cout, num_classes)
        params["head"].append((w_lin, b_lin))
        cin = cout
    return params


# ----------------------------- reference check -------------------------------


def _reference_forward(x_nchw, params):
    """Pure-JAX (f32) reference matching the PyTorch module semantics."""
    feat = jnp.transpose(x_nchw, (0, 2, 3, 1))
    outs = []
    for (w_conv, b_conv), (w_lin, b_lin) in zip(params["enc"], params["head"]):
        y = lax.conv_general_dilated(
            feat, w_conv, window_strides=(1, 1), padding="SAME",
            dimension_numbers=("NHWC", "HWIO", "NHWC"))
        feat = jnp.maximum(y + b_conv[None, None, None, :], 0.0)
        pooled = jnp.mean(feat, axis=(1, 2))
        outs.append(pooled @ w_lin + b_lin)
    return tuple(outs)


if __name__ == "__main__":
    key = jax.random.PRNGKey(0)
    key, kx, kp = jax.random.split(key, 3)

    # Small shapes consistent with the module: NCHW input, 3 encoder stages.
    N, C, H, W = 2, 4, 16, 16
    stage_channels = (8, 16, 16)
    num_classes = 10

    x = jax.random.normal(kx, (N, C, H, W), jnp.float32)
    params = init_multi_sub_model_params(kp, C, stage_channels, num_classes)

    outs = jax.block_until_ready(multi_sub_model_forward(x, params))

    refs = _reference_forward(x, params)
    for o, r in zip(outs, refs):
        assert o.shape == (N, num_classes)
        err = float(jnp.max(jnp.abs(o - r)))
        # bf16 MXU inputs (f32 accumulation) => loosened tolerance vs f32 ref.
        assert err < 5e-2, err

    print("KERNEL_OK")
</pallas_src>

<mosaic_0001>
module attributes {stable_mosaic.version = 11 : i64} {
  func.func @probe(%arg0: memref<8x128xf32, #tpu.memory_space<vmem>>, %arg1: memref<8x128xf32, #tpu.memory_space<vmem>>) attributes {dimension_semantics = [], scalar_prefetch = 0 : i64, scratch_operands = 0 : i64, tpu.core_type = #tpu.core_type<tc>} {
    %c0 = arith.constant 0 : index
    %c0_0 = arith.constant 0 : index
    %0 = vector.load %arg0[%c0, %c0_0] : memref<8x128xf32, #tpu.memory_space<vmem>>, vector<8x128xf32>
    %c1_i32 = arith.constant 1 : i32
    %1 = tpu.dynamic_rotate %0 by %c1_i32 dim 0 : vector<8x128xf32>, i32 -> vector<8x128xf32>
    %c0_1 = arith.constant 0 : index
    %c0_2 = arith.constant 0 : index
    %2 = vector.load %arg1[%c0_1, %c0_2] : memref<8x128xf32, #tpu.memory_space<vmem>>, vector<8x128xf32>
    tpu.vector_store %arg1[%c0_1, %c0_2], %1 {strides = array<i32>} : memref<8x128xf32, #tpu.memory_space<vmem>>, vector<8x128xf32>,
    return
  }
}

</mosaic_0001>

<bundles_post_ra>
// kernel: tpu_custom_call.1
= control target key start
LH: loop header
LB: loop body
LE: loop exit
PB: predicated region body
PF: predicated region fallthrough
CT: control target
= control target key end

     0   :  { %6 = vsyncpa [#allocation3], 0  ;;  %s103_s0 = inlined_call_operand.hbm [shape: f32[8,128], index: 0, kind: input, shape index: {}]   ;;  %s104_s1 = inlined_call_operand.hbm [shape: f32[8,128], index: 1, kind: output, shape index: {}]  }
   0x1   :  { %7 = vsyncpa [#allocation4], 0  ;;  %s85_s6 = smov [#allocation2]  }
   0x2   :  { %s14_s7 = sshll.u32 %s85_s6, 4  ;;  %s15_s7 = int_to_ptr.vmem [resolvable:$true] %s14_s7 }
   0x3   :  { %s49_s8 = scalar_lea.vmem %s15_s7, 128  ;;  %p54_p1 = scmp.lt.s32.totalorder %s15_s7, %s15_s7 }
   0x4   :  { %p50_p0 = scmp.ne.s32.totalorder %s15_s7, %s49_s8  ;;  %p55_p2 = scmp.lt.s32.totalorder %s49_s8, %s49_s8 }
   0x6   :  { %p56_p3 = por %p55_p2, %p54_p1 }
   0x8   :  { %p57_p4 = pnand %p56_p3, %p50_p0 }
   0xa   :  { %60 = shalt.err (!%p57_p4)
}
   0xb   :  { %17 = dma.hbm_to_vmem [thread:$0]  %s103_s0, 128, %s15_s7, [#allocation3]  }
   0xc   :  { %81 = dma.done.wait [#allocation3], 128  }
   0xd   :  { %82 = vsyncadd [#allocation3], 4294967168  ;;  %s86_s11 = smov [#allocation5]   ;;  %v21_v0 = vld [vmem:[#allocation2] sm:$0xff] }
   0xe   :  { %s30_s12 = sshll.u32 %s86_s11, 4  ;;  %v22_v1 = vrot.slane %v21_v0, 7  ;;  %s31_s12 = int_to_ptr.vmem [resolvable:$true] %s30_s12 }
   0xf   :  { %s61_s13 = scalar_lea.vmem %s31_s12, 128  ;;  %p66_p6 = scmp.lt.s32.totalorder %s31_s12, %s31_s12 }
  0x10   :  { %23 = vst [vmem:[#allocation5] sm:$0xff] %v22_v1  ;;  %p62_p5 = scmp.ne.s32.totalorder %s31_s12, %s61_s13  ;;  %p67_p7 = scmp.lt.s32.totalorder %s61_s13, %s61_s13 }
  0x12   :  { %p68_p8 = por %p67_p7, %p66_p6 }
  0x14   :  { %p69_p9 = pnand %p68_p8, %p62_p5 }
  0x16   :  { %72 = shalt.err (!%p69_p9)
}
  0x17   :  { %33 = dma.vmem_to_hbm [thread:$0]  %s31_s12, 128, %s104_s1, [#allocation4]  }
  0x18   :  { %83 = dma.done.wait [#allocation4], 128  }
  0x19   :  { %84 = vsyncadd [#allocation4], 4294967168 }
  0x1a   :  { %37 = vsyncpa [#allocation3], 1 }
  0x1b   :  { %38 = vsyncpa [#allocation4], 1 }

</bundles_post_ra>
